<compile_context>
chip_gen: v7x
topology: tpu7x:2x2x1
jax: 0.10.0
libtpu: 0.0.40
codegen_flags: <defaults>
</compile_context>

<pallas_src>
import functools

import jax
import jax.numpy as jnp
import numpy as np
from jax.experimental import pallas as pl
from jax.experimental.pallas import tpu as pltpu

# Finite "-inf": tanh scores are in [-1, 1], so -1e30 dominates any real score
# while avoiding -inf/-inf NaNs inside the online-softmax update.
_NEG_INF = -1e30


def _round_up(x, m):
    return ((x + m - 1) // m) * m


def soft_attention_kernel(x_ref, w_ref, m_ref, o_ref, m_sc, l_sc, acc_sc):
    """One (BB batch rows) x (TS seq positions) tile of masked soft attention.

    x_ref:  (BB, TS, H)   inputs tile
    w_ref:  (BB, 1, H)    attention weight row (broadcast over batch in wrapper)
    m_ref:  (BB, 1, TS)   float keep-mask (1.0 keep / 0.0 drop)
    o_ref:  (BB, 1, H)    pooled output (written at the last seq step)
    m_sc:   (BB, 1, 1)    running max          (VMEM scratch, f32)
    l_sc:   (BB, 1, 1)    running softmax denom (VMEM scratch, f32)
    acc_sc: (BB, 1, H)    running weighted sum  (VMEM scratch, f32)
    """
    s_idx = pl.program_id(1)

    @pl.when(s_idx == 0)
    def _init():
        m_sc[...] = jnp.full_like(m_sc, _NEG_INF)
        l_sc[...] = jnp.zeros_like(l_sc)
        acc_sc[...] = jnp.zeros_like(acc_sc)

    x = x_ref[...]                      # (BB, TS, H)
    w = w_ref[...]                      # (BB, 1, H)
    keep = m_ref[...]                   # (BB, 1, TS) float 1/0

    # eij[b, 0, s] = tanh(sum_h x[b, s, h] * w[h])    -- lane-dense over seq.
    scores = jnp.einsum('bqd,bkd->bqk', w, x,
                        preferred_element_type=jnp.float32)      # (BB, 1, TS)
    eij = jnp.tanh(scores)
    logits = jnp.where(keep > 0.0, eij, _NEG_INF)                # (BB, 1, TS)

    # Online (flash-style) softmax update over the seq-tile grid axis.
    m_prev = m_sc[...]                                           # (BB, 1, 1)
    m_cur = jnp.max(logits, axis=-1, keepdims=True)
    m_new = jnp.maximum(m_prev, m_cur)
    alpha = jnp.exp(m_prev - m_new)                              # rescale old stats
    # Multiply by `keep` so masked (and padded) positions contribute exactly 0,
    # even if an entire tile is masked.
    p = jnp.exp(logits - m_new) * keep                           # (BB, 1, TS)

    l_sc[...] = alpha * l_sc[...] + jnp.sum(p, axis=-1, keepdims=True)
    acc_sc[...] = alpha * acc_sc[...] + jnp.einsum(
        'bqk,bkd->bqd', p.astype(x.dtype), x,
        preferred_element_type=jnp.float32)                      # (BB, 1, H)
    m_sc[...] = m_new

    @pl.when(s_idx == pl.num_programs(1) - 1)
    def _finalize():
        inv_l = pl.reciprocal(l_sc[...], approx=True)            # EUP slot
        o_ref[...] = (acc_sc[...] * inv_l).astype(o_ref.dtype)


@functools.partial(jax.jit, static_argnames=("block_b", "block_s"))
def _soft_attention_call(inputs, w_row, mask_f, *, block_b, block_s):
    B, S, H = inputs.shape
    BB, TS = block_b, block_s
    B_pad = _round_up(B, BB)
    S_pad = _round_up(S, TS)
    itemsize = jnp.dtype(inputs.dtype).itemsize

    # Pad seq (dropped via mask=0) and batch (kept via mask=1, x=0 -> harmless).
    if S_pad != S:
        inputs = jnp.pad(inputs, ((0, 0), (0, S_pad - S), (0, 0)))
        mask_f = jnp.pad(mask_f, ((0, 0), (0, 0), (0, S_pad - S)))
    if B_pad != B:
        inputs = jnp.pad(inputs, ((0, B_pad - B), (0, 0), (0, 0)))
        mask_f = jnp.pad(mask_f, ((0, B_pad - B), (0, 0), (0, 0)),
                         constant_values=1.0)

    w_b = jnp.broadcast_to(w_row.reshape(1, 1, H), (BB, 1, H))

    grid = (B_pad // BB, S_pad // TS)

    # VMEM working-set estimate (double-buffered inputs + resident out/scratch).
    est = (2 * BB * TS * H * itemsize            # inputs
           + 2 * BB * TS * 4                     # mask
           + 2 * BB * H * 4                      # weight
           + 2 * BB * H * itemsize               # output
           + BB * H * 4 + 8 * BB)                # scratch
    vmem_limit = int(min(max(est * 3 // 2, 32 * 1024 * 1024), 64 * 1024 * 1024))

    out = pl.pallas_call(
        soft_attention_kernel,
        out_shape=jax.ShapeDtypeStruct((B_pad, 1, H), inputs.dtype),
        grid_spec=pltpu.PrefetchScalarGridSpec(
            num_scalar_prefetch=0,
            grid=grid,
            in_specs=[
                pl.BlockSpec((BB, TS, H), lambda b, s: (b, s, 0)),   # inputs tile
                pl.BlockSpec((BB, 1, H), lambda b, s: (0, 0, 0)),    # weight row
                pl.BlockSpec((BB, 1, TS), lambda b, s: (b, 0, s)),   # keep mask
            ],
            out_specs=pl.BlockSpec((BB, 1, H), lambda b, s: (b, 0, 0)),
            scratch_shapes=[
                pltpu.VMEM((BB, 1, 1), jnp.float32),   # running max
                pltpu.VMEM((BB, 1, 1), jnp.float32),   # running denom
                pltpu.VMEM((BB, 1, H), jnp.float32),   # running weighted sum
            ],
        ),
        compiler_params=pltpu.CompilerParams(
            dimension_semantics=("parallel", "arbitrary"),
            vmem_limit_bytes=vmem_limit,
        ),
    )(inputs, w_b, mask_f)

    return out.reshape(B_pad, H)[:B]


def soft_attention(inputs, weight, mask=None, *, block_b=None, block_s=None):
    """inputs: (B, S, H); weight: (H, 1); mask: (B, S) bool (True = keep) or None."""
    B, S, H = inputs.shape

    if mask is None:
        mask_f = jnp.ones((B, 1, S), dtype=jnp.float32)
    else:
        mask_f = mask.astype(jnp.float32).reshape(B, 1, S)

    # Batch tile: 8 rows per grid step when possible (dense stores, amortized
    # per-step overhead); small B runs un-padded.
    BB = block_b if block_b is not None else (8 if B >= 8 else B)

    # Seq tile: keep each (double-buffered) input block around <=8 MiB so the
    # pipeline fits the scoped-VMEM defaults on v5e/v6e and v7x's 64 MiB VMEM.
    if block_s is not None:
        TS = block_s
    else:
        itemsize = jnp.dtype(inputs.dtype).itemsize
        ts_cap = (8 * 1024 * 1024) // max(1, BB * H * itemsize)
        ts_cap = max(128, (ts_cap // 128) * 128)
        TS = S if S <= ts_cap else ts_cap

    w_row = weight.astype(jnp.float32).reshape(1, H)
    return _soft_attention_call(inputs, w_row, mask_f, block_b=BB, block_s=TS)


def soft_attention_reference(inputs, weight, mask=None):
    """Pure-JAX reference mirroring the PyTorch forward exactly."""
    eij = jnp.tanh(jnp.matmul(inputs, weight).squeeze(-1))       # (B, S)
    if mask is not None:
        eij = eij + jnp.where(mask, 0.0, -jnp.inf).astype(eij.dtype)
    a = jax.nn.softmax(eij, axis=1)[..., None]                   # (B, S, 1)
    return jnp.sum(inputs * a, axis=1)                           # (B, H)


def _run_case(key, B, S, H, with_mask, **kw):
    k_x, k_w, k_l = jax.random.split(key, 3)
    x = jax.random.normal(k_x, (B, S, H), dtype=jnp.float32)
    w = jax.random.uniform(k_w, (H, 1), dtype=jnp.float32)       # nn.init.uniform_
    if with_mask:
        lengths = jax.random.randint(k_l, (B,), 1, S + 1)        # >=1 token kept
        mask = jnp.arange(S)[None, :] < lengths[:, None]         # (B, S) bool
    else:
        mask = None
    out = jax.block_until_ready(soft_attention(x, w, mask, **kw))
    ref = soft_attention_reference(x, w, mask)
    # tolerance accommodates the EUP approx-reciprocal in the softmax denom
    np.testing.assert_allclose(np.asarray(out), np.asarray(ref),
                               rtol=2e-3, atol=2e-3)


if __name__ == "__main__":
    # Shapes implied by the module: (batch=2, seq=8, hidden=32), masked + unmasked.
    _run_case(jax.random.PRNGKey(0), B=2, S=8, H=32, with_mask=True)
    _run_case(jax.random.PRNGKey(1), B=2, S=8, H=32, with_mask=False)
    # Exercise batch tiling + multi-step online softmax over seq tiles.
    _run_case(jax.random.PRNGKey(2), B=16, S=256, H=128, with_mask=True,
              block_b=8, block_s=128)
    # Exercise batch padding (B not a multiple of BB).
    _run_case(jax.random.PRNGKey(3), B=5, S=64, H=32, with_mask=True, block_b=8)
    print("KERNEL_OK")
</pallas_src>

<mosaic_0001>
module attributes {stable_mosaic.version = 11 : i64} {
  func.func @soft_attention_kernel(%arg0: i32, %arg1: i32, %arg2: memref<2x8x32xf32, #tpu.memory_space<vmem>>, %arg3: memref<2x1x32xf32, #tpu.memory_space<vmem>>, %arg4: memref<2x1x8xf32, #tpu.memory_space<vmem>>, %arg5: memref<2x1x32xf32, #tpu.memory_space<vmem>>, %arg6: memref<2x1x1xf32, #tpu.memory_space<vmem>>, %arg7: memref<2x1x1xf32, #tpu.memory_space<vmem>>, %arg8: memref<2x1x32xf32, #tpu.memory_space<vmem>>) attributes {dimension_semantics = [#tpu.dimension_semantics<parallel>, #tpu.dimension_semantics<arbitrary>], iteration_bounds = array<i64: 1, 1>, scalar_prefetch = 0 : i64, scratch_operands = 3 : i64, tpu.core_type = #tpu.core_type<tc>, window_params = [{transform_indices = @transform_0, window_bounds = array<i64: 2, 8, 32>}, {pipeline_mode = #tpu.pipeline_mode<synchronous>, transform_indices = @transform_1, window_bounds = array<i64: 2, 1, 32>}, {transform_indices = @transform_2, window_bounds = array<i64: 2, 1, 8>}, {transform_indices = @transform_3, window_bounds = array<i64: 2, 1, 32>}]} {
    %c0_i32 = arith.constant 0 : i32
    %0 = arith.cmpi eq, %arg1, %c0_i32 : i32
    %1 = arith.extui %0 : i1 to i32
    %c0_i32_0 = arith.constant 0 : i32
    %2 = arith.cmpi ne, %1, %c0_i32_0 : i32
    scf.if %2 {
      %cst_34 = arith.constant -1.000000e+30 : f32
      %38 = vector.broadcast %cst_34 : f32 to vector<2x1x1xf32>
      %c0_35 = arith.constant 0 : index
      %c0_36 = arith.constant 0 : index
      %c0_37 = arith.constant 0 : index
      %39 = vector.load %arg6[%c0_35, %c0_36, %c0_37] : memref<2x1x1xf32, #tpu.memory_space<vmem>>, vector<2x1x1xf32>
      tpu.vector_store %arg6[%c0_35, %c0_36, %c0_37], %38 {strides = array<i32>} : memref<2x1x1xf32, #tpu.memory_space<vmem>>, vector<2x1x1xf32>,
      %cst_38 = arith.constant 0.000000e+00 : f32
      %40 = vector.broadcast %cst_38 : f32 to vector<2x1x1xf32>
      %c0_39 = arith.constant 0 : index
      %c0_40 = arith.constant 0 : index
      %c0_41 = arith.constant 0 : index
      %41 = vector.load %arg7[%c0_39, %c0_40, %c0_41] : memref<2x1x1xf32, #tpu.memory_space<vmem>>, vector<2x1x1xf32>
      tpu.vector_store %arg7[%c0_39, %c0_40, %c0_41], %40 {strides = array<i32>} : memref<2x1x1xf32, #tpu.memory_space<vmem>>, vector<2x1x1xf32>,
      %cst_42 = arith.constant 0.000000e+00 : f32
      %42 = vector.broadcast %cst_42 : f32 to vector<2x1x32xf32>
      %c0_43 = arith.constant 0 : index
      %c0_44 = arith.constant 0 : index
      %c0_45 = arith.constant 0 : index
      %43 = vector.load %arg8[%c0_43, %c0_44, %c0_45] : memref<2x1x32xf32, #tpu.memory_space<vmem>>, vector<2x1x32xf32>
      tpu.vector_store %arg8[%c0_43, %c0_44, %c0_45], %42 {strides = array<i32>} : memref<2x1x32xf32, #tpu.memory_space<vmem>>, vector<2x1x32xf32>,
    } else {
    }
    %c0 = arith.constant 0 : index
    %c0_1 = arith.constant 0 : index
    %c0_2 = arith.constant 0 : index
    %3 = vector.load %arg2[%c0, %c0_1, %c0_2] : memref<2x8x32xf32, #tpu.memory_space<vmem>>, vector<2x8x32xf32>
    %c0_3 = arith.constant 0 : index
    %c0_4 = arith.constant 0 : index
    %c0_5 = arith.constant 0 : index
    %4 = vector.load %arg3[%c0_3, %c0_4, %c0_5] : memref<2x1x32xf32, #tpu.memory_space<vmem>>, vector<2x1x32xf32>
    %c0_6 = arith.constant 0 : index
    %c0_7 = arith.constant 0 : index
    %c0_8 = arith.constant 0 : index
    %5 = vector.load %arg4[%c0_6, %c0_7, %c0_8] : memref<2x1x8xf32, #tpu.memory_space<vmem>>, vector<2x1x8xf32>
    "tpu.trace_start"() <{level = 10 : i32, message = "bqd,bkd->bqk"}> : () -> ()
    %cst = arith.constant dense<0.000000e+00> : vector<2x1x8xf32>
    %6 = tpu.matmul %4, %3, %cst {dimension_numbers = #tpu.dot_dimension_numbers<[2], [2], [1], [1], [0, 0, 0, 1, 1, 1], [0], [0]>} : vector<2x1x32xf32>, vector<2x8x32xf32>, vector<2x1x8xf32> -> vector<2x1x8xf32>
    "tpu.trace_stop"() : () -> ()
    %7 = math.tanh %6 : vector<2x1x8xf32>
    %cst_9 = arith.constant 0.000000e+00 : f32
    %8 = vector.broadcast %cst_9 : f32 to vector<2x1x8xf32>
    %9 = arith.cmpf ogt, %5, %8 : vector<2x1x8xf32>
    %cst_10 = arith.constant -1.000000e+30 : f32
    %10 = vector.broadcast %cst_10 : f32 to vector<2x1x8xf32>
    %11 = arith.select %9, %7, %10 : vector<2x1x8xi1>, vector<2x1x8xf32>
    %c0_11 = arith.constant 0 : index
    %c0_12 = arith.constant 0 : index
    %c0_13 = arith.constant 0 : index
    %12 = vector.load %arg6[%c0_11, %c0_12, %c0_13] : memref<2x1x1xf32, #tpu.memory_space<vmem>>, vector<2x1x1xf32>
    %cst_14 = arith.constant dense<0xFF800000> : vector<2x1xf32>
    %13 = vector.multi_reduction <maximumf>, %11, %cst_14 [2] : vector<2x1x8xf32> to vector<2x1xf32>
    %14 = vector.shape_cast %13 : vector<2x1xf32> to vector<2x1x1xf32>
    %15 = arith.maximumf %12, %14 : vector<2x1x1xf32>
    %16 = arith.subf %12, %15 : vector<2x1x1xf32>
    %17 = math.exp %16 : vector<2x1x1xf32>
    %18 = vector.broadcast %15 : vector<2x1x1xf32> to vector<2x1x8xf32>
    %19 = arith.subf %11, %18 : vector<2x1x8xf32>
    %20 = math.exp %19 : vector<2x1x8xf32>
    %21 = arith.mulf %20, %5 : vector<2x1x8xf32>
    %c0_15 = arith.constant 0 : index
    %c0_16 = arith.constant 0 : index
    %c0_17 = arith.constant 0 : index
    %22 = vector.load %arg7[%c0_15, %c0_16, %c0_17] : memref<2x1x1xf32, #tpu.memory_space<vmem>>, vector<2x1x1xf32>
    %23 = arith.mulf %17, %22 : vector<2x1x1xf32>
    %cst_18 = arith.constant dense<0.000000e+00> : vector<2x1xf32>
    %24 = vector.multi_reduction <add>, %21, %cst_18 [2] : vector<2x1x8xf32> to vector<2x1xf32>
    %25 = vector.shape_cast %24 : vector<2x1xf32> to vector<2x1x1xf32>
    %26 = arith.addf %23, %25 : vector<2x1x1xf32>
    %c0_19 = arith.constant 0 : index
    %c0_20 = arith.constant 0 : index
    %c0_21 = arith.constant 0 : index
    %27 = vector.load %arg7[%c0_19, %c0_20, %c0_21] : memref<2x1x1xf32, #tpu.memory_space<vmem>>, vector<2x1x1xf32>
    tpu.vector_store %arg7[%c0_19, %c0_20, %c0_21], %26 {strides = array<i32>} : memref<2x1x1xf32, #tpu.memory_space<vmem>>, vector<2x1x1xf32>,
    %c0_22 = arith.constant 0 : index
    %c0_23 = arith.constant 0 : index
    %c0_24 = arith.constant 0 : index
    %28 = vector.load %arg8[%c0_22, %c0_23, %c0_24] : memref<2x1x32xf32, #tpu.memory_space<vmem>>, vector<2x1x32xf32>
    %29 = vector.broadcast %17 : vector<2x1x1xf32> to vector<2x1x32xf32>
    %30 = arith.mulf %29, %28 : vector<2x1x32xf32>
    "tpu.trace_start"() <{level = 10 : i32, message = "bqk,bkd->bqd"}> : () -> ()
    %cst_25 = arith.constant dense<0.000000e+00> : vector<2x1x32xf32>
    %31 = tpu.matmul %21, %3, %cst_25 {dimension_numbers = #tpu.dot_dimension_numbers<[2], [1], [1], [2], [0, 0, 0, 1, 1, 2], [0], [0]>} : vector<2x1x8xf32>, vector<2x8x32xf32>, vector<2x1x32xf32> -> vector<2x1x32xf32>
    "tpu.trace_stop"() : () -> ()
    %32 = arith.addf %30, %31 : vector<2x1x32xf32>
    %c0_26 = arith.constant 0 : index
    %c0_27 = arith.constant 0 : index
    %c0_28 = arith.constant 0 : index
    %33 = vector.load %arg8[%c0_26, %c0_27, %c0_28] : memref<2x1x32xf32, #tpu.memory_space<vmem>>, vector<2x1x32xf32>
    tpu.vector_store %arg8[%c0_26, %c0_27, %c0_28], %32 {strides = array<i32>} : memref<2x1x32xf32, #tpu.memory_space<vmem>>, vector<2x1x32xf32>,
    %c0_29 = arith.constant 0 : index
    %c0_30 = arith.constant 0 : index
    %c0_31 = arith.constant 0 : index
    %34 = vector.load %arg6[%c0_29, %c0_30, %c0_31] : memref<2x1x1xf32, #tpu.memory_space<vmem>>, vector<2x1x1xf32>
    tpu.vector_store %arg6[%c0_29, %c0_30, %c0_31], %15 {strides = array<i32>} : memref<2x1x1xf32, #tpu.memory_space<vmem>>, vector<2x1x1xf32>,
    %c0_i32_32 = arith.constant 0 : i32
    %35 = arith.cmpi eq, %arg1, %c0_i32_32 : i32
    %36 = arith.extui %35 : i1 to i32
    %c0_i32_33 = arith.constant 0 : i32
    %37 = arith.cmpi ne, %36, %c0_i32_33 : i32
    scf.if %37 {
      %c0_34 = arith.constant 0 : index
      %c0_35 = arith.constant 0 : index
      %c0_36 = arith.constant 0 : index
      %38 = vector.load %arg7[%c0_34, %c0_35, %c0_36] : memref<2x1x1xf32, #tpu.memory_space<vmem>>, vector<2x1x1xf32>
      %39 = tpu.reciprocal %38 {approx = true} : vector<2x1x1xf32> -> vector<2x1x1xf32>
      %c0_37 = arith.constant 0 : index
      %c0_38 = arith.constant 0 : index
      %c0_39 = arith.constant 0 : index
      %40 = vector.load %arg8[%c0_37, %c0_38, %c0_39] : memref<2x1x32xf32, #tpu.memory_space<vmem>>, vector<2x1x32xf32>
      %41 = vector.broadcast %39 : vector<2x1x1xf32> to vector<2x1x32xf32>
      %42 = arith.mulf %40, %41 : vector<2x1x32xf32>
      %c0_40 = arith.constant 0 : index
      %c0_41 = arith.constant 0 : index
      %c0_42 = arith.constant 0 : index
      %43 = vector.load %arg5[%c0_40, %c0_41, %c0_42] : memref<2x1x32xf32, #tpu.memory_space<vmem>>, vector<2x1x32xf32>
      tpu.vector_store %arg5[%c0_40, %c0_41, %c0_42], %42 {strides = array<i32>} : memref<2x1x32xf32, #tpu.memory_space<vmem>>, vector<2x1x32xf32>,
    } else {
    }
    return
  }
  func.func @transform_0(%arg0: i32, %arg1: i32) -> (i32, i32, i32) {
    %c0_i32 = arith.constant 0 : i32
    %c0_i32_0 = arith.constant 0 : i32
    return %arg0, %arg1, %c0_i32 : i32, i32, i32
  }
  func.func @transform_1(%arg0: i32, %arg1: i32) -> (i32, i32, i32) {
    %c0_i32 = arith.constant 0 : i32
    %c0_i32_0 = arith.constant 0 : i32
    %c0_i32_1 = arith.constant 0 : i32
    %c0_i32_2 = arith.constant 0 : i32
    return %c0_i32, %c0_i32_0, %c0_i32_1 : i32, i32, i32
  }
  func.func @transform_2(%arg0: i32, %arg1: i32) -> (i32, i32, i32) {
    %c0_i32 = arith.constant 0 : i32
    %c0_i32_0 = arith.constant 0 : i32
    return %arg0, %c0_i32, %arg1 : i32, i32, i32
  }
  func.func @transform_3(%arg0: i32, %arg1: i32) -> (i32, i32, i32) {
    %c0_i32 = arith.constant 0 : i32
    %c0_i32_0 = arith.constant 0 : i32
    %c0_i32_1 = arith.constant 0 : i32
    return %arg0, %c0_i32, %c0_i32_0 : i32, i32, i32
  }
}

</mosaic_0001>

<bundles_post_ra>
// kernel: _soft_attention_call.1
= control target key start
LH: loop header
LB: loop body
LE: loop exit
PB: predicated region body
PF: predicated region fallthrough
CT: control target
= control target key end

     0   :  { %8 = vsyncpa [#allocation6], 0  ;;  %s706_s0 = inlined_call_operand.hbm [shape: f32[2,8,32], index: 0, kind: input, shape index: {}]   ;;  %s707_s1 = inlined_call_operand.vmem [shape: f32[2,1,32], index: 1, kind: input, shape index: {}]   ;;  %s708_s2 = inlined_call_operand.vmem [shape: f32[2,1,8], index: 2, kind: input, shape index: {}]   ;;  %s709_s3 = inlined_call_operand.hbm [shape: f32[2,1,32], index: 3, kind: output, shape index: {}]  }
   0x1   :  { %9 = vsyncpa [#allocation7], 0  ;;  %s598_s12 = smov [#allocation5]   ;;  %s550_s16 = scalar_lea.hbm %s706_s0, 256 }
   0x2   :  { %s15_s13 = sshll.u32 %s598_s12, 4  ;;  %p551_p0 = scmp.ne.s32.totalorder %s706_s0, %s550_s16  ;;  %s16_s13 = int_to_ptr.vmem [resolvable:$true] %s15_s13 }
   0x3   :  { %p554_p1 = scmp.lt.u32.totalorder %s550_s16, %s706_s0 }
   0x5   :  { %p556_p2 = pnand %p554_p1, %p551_p0 }
   0x7   :  { %559 = shalt.err (!%p556_p2)
}
   0x8   :  { %s560_s21 = scalar_lea.vmem %s16_s13, 256  ;;  %p565_p4 = scmp.lt.s32.totalorder %s16_s13, %s16_s13 }
   0x9   :  { %p561_p3 = scmp.ne.s32.totalorder %s16_s13, %s560_s21  ;;  %p566_p5 = scmp.lt.s32.totalorder %s560_s21, %s560_s21 }
   0xb   :  { %p567_p6 = por %p566_p5, %p565_p4 }
   0xd   :  { %p568_p7 = pnand %p567_p6, %p561_p3 }
   0xf   :  { %571 = shalt.err (!%p568_p7)
}
  0x10   :  { %s599_s22 = smov 128   ;;  %s600_s23 = smov 8  }
  0x11   :  { %21 = dma.hbm_to_vmem [thread:$0]  %s706_s0, 256, %s16_s13, [#allocation6], %s599_s22, %s599_s22, %s600_s23  }
  0x12   :  { %594 = dma.done.wait [#allocation6], 256  }
  0x13   :  { %595 = vsyncadd [#allocation6], 4294967040  ;;  %v601_v0 = vmov 0.0   ;;  %vm602_vm0 = vmmov 0   ;;  %vm47_vm1 = vcmask 261120   ;;  %v41_v1 = vld [vmem:[#allocation5] sm:$0xff]  ;;  %v228_v27 = vlaneseq }
  0x14   :  { %502 = vmatprep.subr.mxu0 %v601_v0  ;;  %504 = vmatprep.mubr.msk.f32.mxu0 %vm602_vm0, %v601_v0  ;;  %v42_v2 = vld [vmem:[#allocation5 + $0x8] sm:$0xff]  ;;  %v43_v3 = vld [vmem:[%s707_s1] sm:$0x1]  ;;  %v44_v4 = vld [vmem:[%s707_s1 + $0x1] sm:$0x1]  ;;  %vm33_vm2 = vcmask 0  }
  0x15   :  { %507 = vmatprep.subr.mxu1 %v601_v0  ;;  %509 = vmatprep.mubr.msk.f32.mxu1 %vm602_vm0, %v601_v0  ;;  %v603_v5 = vmov -1e+30   ;;  %36 = vst.msk [vmem:[#allocation3] sm:$0x1] %vm33_vm2, %v601_v0  ;;  %37 = vst.msk [vmem:[#allocation3 + $0x1] sm:$0x1] %vm33_vm2, %v601_v0 }
  0x16   :  { %503 = vmatpush3.xpose.msk.msra.mxu0 %vm47_vm1, %v41_v1  ;;  %508 = vmatpush3.xpose.msk.msra.mxu1 %vm47_vm1, %v42_v2  ;;  %34 = vst.msk [vmem:[#allocation2] sm:$0x1] %vm33_vm2, %v603_v5  ;;  %35 = vst.msk [vmem:[#allocation2 + $0x1] sm:$0x1] %vm33_vm2, %v603_v5  ;;  %v45_v10 = vld [vmem:[%s708_s2] sm:$0x1] }
  0x17   :  { %512 = vmatprep.subr.mxu0 %v601_v0  ;;  %517 = vmatprep.subr.mxu1 %v601_v0  ;;  %v46_v11 = vld [vmem:[%s708_s2 + $0x1] sm:$0x1]  ;;  %vm202_vm3 = vcmp.gt.f32.partialorder %v45_v10, 0.0  ;;  %vm208_vm4 = vcmask 57344   ;;  %v604_v18 = vmov 0   ;;  %v229_v28 = vshrl.u32 %v228_v27, 7 }
  0x18   :  { %vm203_vm5 = vcmp.gt.f32.partialorder %v46_v11, 0.0  ;;  %532 = vset.pattern.permute.xlu1 %v604_v18  ;;  %533 = vset.pattern.permute.xlu0 %v604_v18  ;;  %vm286_vm6 = vcmask 64512   ;;  %vm38_vm7 = vcmask 253952   ;;  %s605_s2 = smov [#allocation8]  }
  0x19   :  { %505 = vmatmul.mubr.msk.f32.vlgmr.msra.gmra.mrb[0].mxu0 %vm47_vm1, %v43_v3  ;;  %510 = vmatmul.mubr.msk.f32.vlgmr.msra.gmra.mrb[0].mxu1 %vm47_vm1, %v44_v4  ;;  %v674_v29 = vsub.s32 0, %v229_v28  ;;  %39 = vst.msk [vmem:[#allocation4] sm:$0x1] %vm38_vm7, %v601_v0  ;;  %40 = vst.msk [vmem:[#allocation4 + $0x1] sm:$0x1] %vm38_vm7, %v601_v0  ;;  %s476_s5 = sshll.u32 %s605_s2, 4  ;;  %s477_s5 = int_to_ptr.vmem [resolvable:$true] %s476_s5 }
  0x1a   :  { %513 = vmatpush3.msra.mxu0 %v41_v1  ;;  %514 = vmatprep.mubr.msk.f32.mxu0 %vm602_vm0, %v601_v0  ;;  %s572_s6 = scalar_lea.vmem %s477_s5, 32  ;;  %p577_p9 = scmp.lt.s32.totalorder %s477_s5, %s477_s5 }
  0x1b   :  { %518 = vmatpush3.msra.mxu1 %v42_v2  ;;  %519 = vmatprep.mubr.msk.f32.mxu1 %vm602_vm0, %v601_v0  ;;  %p573_p8 = scmp.ne.s32.totalorder %s477_s5, %s572_s6  ;;  %p578_p10 = scmp.lt.s32.totalorder %s572_s6, %s572_s6 }
  0x1c   :  { %v249_v48 = vld [vmem:[#allocation3] sm:$0x1]  ;;  %v250_v51 = vld [vmem:[#allocation3 + $0x1] sm:$0x1] }
  0x1d   :  { %v206_v19 = vld [vmem:[#allocation2] sm:$0x1]  ;;  %v207_v22 = vld [vmem:[#allocation2 + $0x1] sm:$0x1]  ;;  %p579_p11 = por %p578_p10, %p577_p9 }
  0x1f   :  { %p580_p12 = pnand %p579_p11, %p573_p8 }
  0x20   :  { %v264_v63 = vld [vmem:[#allocation4] sm:$0x1]  ;;  %v265_v3 = vld [vmem:[#allocation4 + $0x1] sm:$0x1] }
  0xec   :  { %v120_v6 = vpop.f32.mrb[0].mxu0  ;;  %v196_v7 = vpop.f32.mrb[0].mxu1 }
  0xed   :  { %534 = vtanh.f32 %v120_v6  ;;  %v506_v8 = vpop.f32.mrb[1].mxu0  ;;  %v511_v9 = vpop.f32.mrb[1].mxu1 }
  0xee   :  { %536 = vtanh.f32 %v196_v7 }
  0xf7   :  { %v535_v12 = vpop.eup %534 }
  0xf8   :  { %v537_v13 = vpop.eup %536  ;;  %v204_v14 = vsel %vm202_vm3, %v535_v12, -1e+30 }
  0xf9   :  { %v209_v15 = vsel %vm208_vm4, %v204_v14, -inf  ;;  %v205_v16 = vsel %vm203_vm5, %v537_v13, -1e+30 }
  0xfa   :  { %210 = vmax.xlane.f32.xlu0 %v209_v15  ;;  %v212_v17 = vsel %vm208_vm4, %v205_v16, -inf }
  0xfe   :  { %213 = vmax.xlane.f32.xlu0 %v212_v17 }
 0x187   :  { %v211_v20 = vpop.xlane.xlu0 %210 }
 0x188   :  { %v215_v21 = vmax.f32 %v206_v19, %v211_v20 }
 0x18a   :  { %v217_v23 = vsub.f32 %v206_v19, %v215_v21  ;;  %438 = vst.msk [vmem:[#allocation2] sm:$0x1] %vm33_vm2, %v215_v21  ;;  %225 = vperm.xlu1 %532, %v215_v21  }
 0x18b   :  { %v214_v24 = vpop.xlane.xlu0 %213 }
 0x18c   :  { %v216_v25 = vmax.f32 %v207_v22, %v214_v24  ;;  %v219_v45 = vmul.f32 1.442695, %v217_v23 }
 0x18e   :  { %v218_v26 = vsub.f32 %v207_v22, %v216_v25  ;;  %439 = vst.msk [vmem:[#allocation2 + $0x1] sm:$0x1] %vm33_vm2, %v216_v25  ;;  %234 = vperm.xlu1 %532, %v216_v25  }
 0x190   :  { %v221_v44 = vmul.f32 1.442695, %v218_v26 }
 0x209   :  { %v226_v30 = vpop.permute.xlu1 %225 }
 0x20a   :  { %v231_v31 = vrot.slane %v226_v30, %v674_v29 }
 0x20c   :  { %v241_v32 = vsub.f32 %v204_v14, %v231_v31 }
 0x20d   :  { %v235_v33 = vpop.permute.xlu1 %234 }
 0x20e   :  { %v243_v34 = vmul.f32 1.442695, %v241_v32  ;;  %v240_v35 = vrot.slane %v235_v33, %v674_v29 }
 0x210   :  { %538 = vpow2.f32 %v243_v34  ;;  %v242_v36 = vsub.f32 %v205_v16, %v240_v35 }
 0x212   :  { %v245_v37 = vmul.f32 1.442695, %v242_v36 }
 0x214   :  { %540 = vpow2.f32 %v245_v37 }
 0x215   :  { %542 = vpow2.f32 %v221_v44 }
 0x216   :  { %544 = vpow2.f32 %v219_v45 }
 0x21a   :  { %v539_v38 = vpop.eup %538 }
 0x21b   :  { %v247_v39 = vmul.f32 %v539_v38, %v45_v10 }
 0x21d   :  { %515 = vmatmul.mubr.msk.f32.vlgmr.msra.gmra.mrb[2].mxu0 %vm286_vm6, %v247_v39  ;;  %v253_v40 = vsel %vm208_vm4, %v247_v39, 0.0 }
 0x21e   :  { %v541_v41 = vpop.eup %540  ;;  %254 = vadd.xlane.f32.xlu0 %v253_v40 }
 0x21f   :  { %v248_v42 = vmul.f32 %v541_v41, %v46_v11  ;;  %v543_v46 = vpop.eup %542 }
 0x220   :  { %v545_v47 = vpop.eup %544  ;;  %v252_v53 = vmul.f32 %v543_v46, %v250_v51 }
 0x221   :  { %520 = vmatmul.mubr.msk.f32.vlgmr.msra.gmra.mrb[2].mxu1 %vm286_vm6, %v248_v42  ;;  %v256_v43 = vsel %vm208_vm4, %v248_v42, 0.0  ;;  %v251_v49 = vmul.f32 %v545_v47, %v249_v48 }
 0x222   :  { %257 = vadd.xlane.f32.xlu1 %v256_v43 }
 0x233   :  { %277 = vperm.xlu1 %532, %v543_v46  }
 0x234   :  { %268 = vperm.xlu0 %533, %v545_v47  }
 0x2ab   :  { %v255_v50 = vpop.xlane.xlu0 %254 }
 0x2ac   :  { %v259_v52 = vadd.f32 %v255_v50, %v251_v49 }
 0x2ae   :  { %262 = vst.msk [vmem:[#allocation3] sm:$0x1] %vm33_vm2, %v259_v52 }
 0x2af   :  { %v258_v54 = vpop.xlane.xlu1 %257 }
 0x2b0   :  { %v260_v55 = vadd.f32 %v258_v54, %v252_v53 }
 0x2b2   :  { %263 = vst.msk [vmem:[#allocation3 + $0x1] sm:$0x1] %vm33_vm2, %v260_v55 }
 0x2b3   :  { %v269_v60 = vpop.permute.xlu0 %268  ;;  %v278_v62 = vpop.permute.xlu1 %277 }
 0x2b4   :  { %v274_v61 = vrot.slane %v269_v60, %v674_v29  ;;  %v283_v0 = vrot.slane %v278_v62, %v674_v29 }
 0x2b5   :  { %v443_v56 = vld [vmem:[#allocation3] sm:$0x1] }
 0x2b6   :  { %546 = vrcp.f32 %v443_v56  ;;  %v284_v1 = vmul.f32 %v274_v61, %v264_v63  ;;  %v285_v6 = vmul.f32 %v283_v0, %v265_v3 }
 0x2b9   :  { %v444_v57 = vld [vmem:[#allocation3 + $0x1] sm:$0x1] }
 0x2ba   :  { %548 = vrcp.f32 %v444_v57 }
 0x2c0   :  { %v547_v58 = vpop.eup %546 }
 0x2c1   :  { %451 = vperm.xlu0 %533, %v547_v58  }
 0x2c4   :  { %v549_v59 = vpop.eup %548 }
 0x2c5   :  { %460 = vperm.xlu0 %533, %v549_v59  }
 0x2f0   :  { %v356_v2 = vpop.f32.mrb[2].mxu0 }
 0x2f1   :  { %v433_v4 = vadd.f32 %v356_v2, %v284_v1  ;;  %v516_v5 = vpop.f32.mrb[3].mxu0 }
 0x2f3   :  { %436 = vst.msk [vmem:[#allocation4] sm:$0x1] %vm38_vm7, %v433_v4 }
 0x2f4   :  { %v429_v7 = vpop.f32.mrb[2].mxu1 }
 0x2f5   :  { %v434_v8 = vadd.f32 %v429_v7, %v285_v6  ;;  %v521_v9 = vpop.f32.mrb[3].mxu1 }
 0x2f7   :  { %437 = vst.msk [vmem:[#allocation4 + $0x1] sm:$0x1] %vm38_vm7, %v434_v8 }
 0x2fa   :  { %v447_v12 = vld [vmem:[#allocation4] sm:$0x1] }
 0x2fe   :  { %v448_v16 = vld [vmem:[#allocation4 + $0x1] sm:$0x1] }
 0x340   :  { %v452_v10 = vpop.permute.xlu0 %451 }
 0x341   :  { %v457_v11 = vrot.slane %v452_v10, %v674_v29 }
 0x343   :  { %v467_v13 = vmul.f32 %v457_v11, %v447_v12 }
 0x344   :  { %v461_v14 = vpop.permute.xlu0 %460 }
 0x345   :  { %469 = vst.msk [vmem:[#allocation8] sm:$0x1] %vm38_vm7, %v467_v13  ;;  %v466_v15 = vrot.slane %v461_v14, %v674_v29 }
 0x347   :  { %v468_v17 = vmul.f32 %v466_v15, %v448_v16 }
 0x349   :  { %470 = vst.msk [vmem:[#allocation8 + $0x1] sm:$0x1] %vm38_vm7, %v468_v17 }
 0x34a   :  { %583 = shalt.err (!%p580_p12)
}
 0x34b   :  { %s584_s9 = scalar_lea.hbm %s709_s3, 32 }
 0x34c   :  { %p585_p13 = scmp.ne.s32.totalorder %s709_s3, %s584_s9  ;;  %p588_p0 = scmp.lt.u32.totalorder %s584_s9, %s709_s3 }
 0x34e   :  { %p590_p1 = pnand %p588_p0, %p585_p13 }
 0x350   :  { %593 = shalt.err (!%p590_p1)
}
 0x351   :  { %s606_s14 = smov 16   ;;  %s607_s15 = smov 1  }
 0x352   :  { %482 = dma.vmem_to_hbm [thread:$0]  %s477_s5, 32, %s709_s3, [#allocation7], %s606_s14, %s606_s14, %s607_s15  }
 0x353   :  { %596 = dma.done.wait [#allocation7], 32  }
 0x354   :  { %597 = vsyncadd [#allocation7], 4294967264 }
 0x355   :  { %486 = vsyncpa [#allocation6], 1 }
 0x356   :  { %487 = vsyncpa [#allocation7], 1 }

</bundles_post_ra>
